<compile_context>
chip_gen: v7x
topology: tpu7x:2x2x1
jax: 0.10.0
libtpu: 0.0.40
codegen_flags: <defaults>
</compile_context>

<pallas_src>
import functools

import jax
import jax.numpy as jnp
import numpy as np
from jax.experimental import pallas as pl
from jax.experimental.pallas import tpu as pltpu

INPUT_SIZE = 20
HIDDEN = 50
NUM_LAYERS = 2
BATCH = 4        # fixed by h0 = zeros(2, 4, 50) in the module's forward

IP = 32          # input width padded to a sublane-friendly size
HP = 128         # hidden width padded to a full lane width (lane-dense stores)
BP = 8           # batch padded to a full sublane tile


def rnn_kernel(x_ref, wih0_ref, b0_ref, wblk_ref, b1_ref,
               y_ref, hn_ref, *, seq_len, unroll):
    # ---- hoisted layer-0 input projection (time-parallel, off the serial chain) ----
    # Written directly into y_ref: row-block t holds P_t = x_t @ Wih0^T + b0 until
    # it is consumed at step t; it is only overwritten (with output_{t-1}) at
    # step t+1, i.e. strictly after its read.
    # NOTE: padded batch rows (4..7) pick up the b0 bias and carry nonzero
    # garbage through the recurrence; rows are independent and the wrapper
    # slices them off -- never reduce over the padded rows.
    y_ref[...] = (
        jnp.dot(x_ref[...], wih0_ref[...], preferred_element_type=jnp.float32)
        + b0_ref[...])

    b1 = b1_ref[...]          # (BP, HP) pre-broadcast layer-1 bias: 1 vreg, kept live

    # ---- wavefront prologue ("iteration 0"): h0_0 = tanh(P_0), h1_{-1} = 0 ----
    p0 = y_ref[pl.ds(0, BP), :]
    carry0 = jnp.concatenate(
        [jnp.tanh(p0), jnp.zeros((BP, HP), jnp.float32)], axis=-1)  # (BP, 2*HP)

    def step(t, carry):
        # carry = [h0_{t-1} | h1_{t-2}]  (BP, 2*HP), register resident.
        row = pl.multiple_of(t * BP, BP)
        row_prev = pl.multiple_of((t - 1) * BP, BP)
        p_t = y_ref[pl.ds(row, BP), :]                       # P_t (BP, HP)
        # addend has no dependence on the carry -> off the serial critical path.
        addend = jnp.concatenate([p_t, b1], axis=-1)         # [P_t | b1]  (BP, 2*HP)
        # ONE fused matmul + ONE tanh on the dependence chain.
        z = jnp.dot(carry, wblk_ref[...],
                    preferred_element_type=jnp.float32)      # (BP, 2*HP)
        h = jnp.tanh(z + addend)                             # [h0_t | h1_{t-1}]
        # lane-dense (BP, 128) store of layer-1 output for timestep t-1
        y_ref[pl.ds(row_prev, BP), :] = h[:, HP:]
        return h

    carry = jax.lax.fori_loop(1, seq_len, step, carry0, unroll=unroll)

    # ---- epilogue ("t = T"): drain layer-1 step T-1 and emit h_n ----
    # carry = [h0_{T-1} | h1_{T-2}]
    z = jnp.dot(carry, wblk_ref[...], preferred_element_type=jnp.float32)
    h1_last = jnp.tanh(z[:, HP:] + b1)                       # h1_{T-1}
    y_ref[pl.ds((seq_len - 1) * BP, BP), :] = h1_last
    hn_ref[0] = carry[:, :HP]                                # h0_{T-1}
    hn_ref[1] = h1_last                                      # h1_{T-1}


def rnn_forward(x, params):
    """x: (B, T, INPUT_SIZE) batch-first float32.  Returns (output, h_n)."""
    B, T, I = x.shape
    assert B == BATCH and I == INPUT_SIZE
    wih0_pad, b0_pad, wblk_pad, b1_pad = params

    # time-major, batch padded to BP, feature padded to IP, flattened to 2-D
    x_tm = jnp.transpose(x, (1, 0, 2))                               # (T, B, I)
    x_tm = jnp.pad(x_tm, ((0, 0), (0, BP - B), (0, IP - I)))         # (T, BP, IP)
    x2 = x_tm.reshape(T * BP, IP)

    # full unroll only for short sequences (compile time / IMEM); partial unroll 8
    # otherwise so the scheduler can hoist P_t loads / y stores across iterations.
    unroll = True if T <= 32 else 8
    kernel = functools.partial(rnn_kernel, seq_len=T, unroll=unroll)
    vmem = pl.BlockSpec(memory_space=pltpu.MemorySpace.VMEM)

    # VMEM budget: x slab (lane-padded to 128 in VMEM) + y slab + weights + h_n,
    # with headroom; never below the common 32 MiB default scoped limit.
    slab_bytes = T * BP * HP * 4 * 2
    weight_bytes = (IP * HP + (2 * HP) * (2 * HP) + HP + BP * HP
                    + NUM_LAYERS * BP * HP) * 4
    vmem_bytes = min(96 * 1024 * 1024,
                     max(32 * 1024 * 1024,
                         int(1.5 * (slab_bytes + weight_bytes)) + (1 << 20)))

    y2, hn_pad = pl.pallas_call(
        kernel,
        out_shape=(
            jax.ShapeDtypeStruct((T * BP, HP), jnp.float32),
            jax.ShapeDtypeStruct((NUM_LAYERS, BP, HP), jnp.float32),
        ),
        in_specs=[vmem] * 5,
        out_specs=(vmem, vmem),
        compiler_params=pltpu.CompilerParams(vmem_limit_bytes=vmem_bytes),
    )(x2, wih0_pad, b0_pad, wblk_pad, b1_pad)

    y = y2.reshape(T, BP, HP)[:, :B, :HIDDEN]                        # (T, B, H)
    output = jnp.transpose(y, (1, 0, 2))                             # (B, T, H)
    h_n = hn_pad[:, :B, :HIDDEN]                                     # (2, B, H)
    return output, h_n


def init_raw_params(key):
    """nn.RNN parameter shapes with PyTorch-style uniform(+-1/sqrt(H)) init."""
    bound = 1.0 / np.sqrt(HIDDEN)
    ks = jax.random.split(key, 8)
    u = lambda k, shape: jax.random.uniform(k, shape, jnp.float32, -bound, bound)
    return dict(
        w_ih_l0=u(ks[0], (HIDDEN, INPUT_SIZE)),
        w_hh_l0=u(ks[1], (HIDDEN, HIDDEN)),
        b_ih_l0=u(ks[2], (HIDDEN,)),
        b_hh_l0=u(ks[3], (HIDDEN,)),
        w_ih_l1=u(ks[4], (HIDDEN, HIDDEN)),
        w_hh_l1=u(ks[5], (HIDDEN, HIDDEN)),
        b_ih_l1=u(ks[6], (HIDDEN,)),
        b_hh_l1=u(ks[7], (HIDDEN,)),
    )


def pack_params(raw):
    """Pre-transpose, zero-pad to lane/sublane-dense shapes, fold the two biases
    per layer, and build the wavefront block weight [[Whh0^T, Wih1^T],[0, Whh1^T]]."""
    wih0_pad = (jnp.zeros((IP, HP), jnp.float32)
                .at[:INPUT_SIZE, :HIDDEN].set(raw["w_ih_l0"].T))
    b0_pad = (jnp.zeros((1, HP), jnp.float32)
              .at[0, :HIDDEN].set(raw["b_ih_l0"] + raw["b_hh_l0"]))
    wblk_pad = (jnp.zeros((2 * HP, 2 * HP), jnp.float32)
                .at[:HIDDEN, :HIDDEN].set(raw["w_hh_l0"].T)
                .at[:HIDDEN, HP:HP + HIDDEN].set(raw["w_ih_l1"].T)
                .at[HP:HP + HIDDEN, HP:HP + HIDDEN].set(raw["w_hh_l1"].T))
    # layer-1 bias pre-broadcast to a full (BP, HP) sublane tile (1 vreg in-kernel)
    b1_pad = (jnp.zeros((BP, HP), jnp.float32)
              .at[:, :HIDDEN].set(raw["b_ih_l1"] + raw["b_hh_l1"]))
    return wih0_pad, b0_pad, wblk_pad, b1_pad


def rnn_forward_ref(x, raw):
    """Pure-JAX reference (same math as torch.nn.RNN with tanh)."""
    h0 = jnp.zeros((x.shape[0], HIDDEN), jnp.float32)
    h1 = jnp.zeros((x.shape[0], HIDDEN), jnp.float32)

    def step(carry, x_t):
        h0, h1 = carry
        h0 = jnp.tanh(x_t @ raw["w_ih_l0"].T + raw["b_ih_l0"]
                      + h0 @ raw["w_hh_l0"].T + raw["b_hh_l0"])
        h1 = jnp.tanh(h0 @ raw["w_ih_l1"].T + raw["b_ih_l1"]
                      + h1 @ raw["w_hh_l1"].T + raw["b_hh_l1"])
        return (h0, h1), h1

    (h0, h1), ys = jax.lax.scan(step, (h0, h1), jnp.transpose(x, (1, 0, 2)))
    return jnp.transpose(ys, (1, 0, 2)), jnp.stack([h0, h1], axis=0)


if __name__ == "__main__":
    key = jax.random.PRNGKey(0)
    pkey, xkey = jax.random.split(key)
    raw = init_raw_params(pkey)
    params = pack_params(raw)

    SEQ = 8
    x = jax.random.normal(xkey, (BATCH, SEQ, INPUT_SIZE), jnp.float32)

    output, h_n = jax.block_until_ready(rnn_forward(x, params))

    out_ref, hn_expected = rnn_forward_ref(x, raw)
    assert output.shape == (BATCH, SEQ, HIDDEN)
    assert h_n.shape == (NUM_LAYERS, BATCH, HIDDEN)
    np.testing.assert_allclose(np.asarray(output), np.asarray(out_ref),
                               atol=1e-5, rtol=1e-5)
    np.testing.assert_allclose(np.asarray(h_n), np.asarray(hn_expected),
                               atol=1e-5, rtol=1e-5)

    print("KERNEL_OK")
</pallas_src>

<mosaic_0001>
module attributes {stable_mosaic.version = 11 : i64} {
  func.func @rnn_kernel(%arg0: memref<64x32xf32, #tpu.memory_space<vmem>>, %arg1: memref<32x128xf32, #tpu.memory_space<vmem>>, %arg2: memref<1x128xf32, #tpu.memory_space<vmem>>, %arg3: memref<256x256xf32, #tpu.memory_space<vmem>>, %arg4: memref<8x128xf32, #tpu.memory_space<vmem>>, %arg5: memref<64x128xf32, #tpu.memory_space<vmem>>, %arg6: memref<2x8x128xf32, #tpu.memory_space<vmem>>) attributes {dimension_semantics = [], scalar_prefetch = 0 : i64, scratch_operands = 0 : i64, tpu.core_type = #tpu.core_type<tc>} {
    %c0 = arith.constant 0 : index
    %c0_0 = arith.constant 0 : index
    %0 = vector.load %arg0[%c0, %c0_0] : memref<64x32xf32, #tpu.memory_space<vmem>>, vector<64x32xf32>
    %c0_1 = arith.constant 0 : index
    %c0_2 = arith.constant 0 : index
    %1 = vector.load %arg1[%c0_1, %c0_2] : memref<32x128xf32, #tpu.memory_space<vmem>>, vector<32x128xf32>
    %cst = arith.constant dense<0.000000e+00> : vector<64x128xf32>
    %2 = tpu.matmul %0, %1, %cst {dimension_numbers = #tpu.dot_dimension_numbers<[1], [0], [0], [1], [0, 0, 1, 1], [], []>} : vector<64x32xf32>, vector<32x128xf32>, vector<64x128xf32> -> vector<64x128xf32>
    %c0_3 = arith.constant 0 : index
    %c0_4 = arith.constant 0 : index
    %3 = vector.load %arg2[%c0_3, %c0_4] : memref<1x128xf32, #tpu.memory_space<vmem>>, vector<1x128xf32>
    %4 = vector.broadcast %3 : vector<1x128xf32> to vector<64x128xf32>
    %5 = arith.addf %2, %4 : vector<64x128xf32>
    %c0_5 = arith.constant 0 : index
    %c0_6 = arith.constant 0 : index
    %6 = vector.load %arg5[%c0_5, %c0_6] : memref<64x128xf32, #tpu.memory_space<vmem>>, vector<64x128xf32>
    tpu.vector_store %arg5[%c0_5, %c0_6], %5 {strides = array<i32>} : memref<64x128xf32, #tpu.memory_space<vmem>>, vector<64x128xf32>,
    %c0_7 = arith.constant 0 : index
    %c0_8 = arith.constant 0 : index
    %7 = vector.load %arg4[%c0_7, %c0_8] : memref<8x128xf32, #tpu.memory_space<vmem>>, vector<8x128xf32>
    %c0_9 = arith.constant 0 : index
    %c0_10 = arith.constant 0 : index
    %8 = vector.load %arg5[%c0_9, %c0_10] : memref<64x128xf32, #tpu.memory_space<vmem>>, vector<8x128xf32>
    %9 = math.tanh %8 : vector<8x128xf32>
    %cst_11 = arith.constant 0.000000e+00 : f32
    %10 = vector.broadcast %cst_11 : f32 to vector<8x128xf32>
    %11 = tpu.concatenate %9, %10 in 1 : vector<8x128xf32>, vector<8x128xf32> -> vector<8x256xf32>
    %c1_i32 = arith.constant 1 : i32
    %c8_i32 = arith.constant 8 : i32
    %12 = arith.muli %c1_i32, %c8_i32 : i32
    %13 = tpu.assume_multiple %12, 8 : i32
    %c1_i32_12 = arith.constant 1 : i32
    %14 = arith.subi %c1_i32, %c1_i32_12 : i32
    %c8_i32_13 = arith.constant 8 : i32
    %15 = arith.muli %14, %c8_i32_13 : i32
    %16 = tpu.assume_multiple %15, 8 : i32
    %17 = arith.index_cast %13 : i32 to index
    %c0_14 = arith.constant 0 : index
    %18 = vector.load %arg5[%17, %c0_14] : memref<64x128xf32, #tpu.memory_space<vmem>>, vector<8x128xf32>
    %19 = tpu.concatenate %18, %7 in 1 : vector<8x128xf32>, vector<8x128xf32> -> vector<8x256xf32>
    %c0_15 = arith.constant 0 : index
    %c0_16 = arith.constant 0 : index
    %20 = vector.load %arg3[%c0_15, %c0_16] : memref<256x256xf32, #tpu.memory_space<vmem>>, vector<256x256xf32>
    %cst_17 = arith.constant dense<0.000000e+00> : vector<8x256xf32>
    %21 = tpu.matmul %11, %20, %cst_17 {dimension_numbers = #tpu.dot_dimension_numbers<[1], [0], [0], [1], [0, 0, 1, 1], [], []>} : vector<8x256xf32>, vector<256x256xf32>, vector<8x256xf32> -> vector<8x256xf32>
    %22 = arith.addf %21, %19 : vector<8x256xf32>
    %23 = math.tanh %22 : vector<8x256xf32>
    %24 = vector.extract_strided_slice %23 {offsets = [0, 128], sizes = [8, 128], strides = [1, 1]} : vector<8x256xf32> to vector<8x128xf32>
    %25 = arith.index_cast %16 : i32 to index
    %c0_18 = arith.constant 0 : index
    %26 = vector.load %arg5[%25, %c0_18] : memref<64x128xf32, #tpu.memory_space<vmem>>, vector<8x128xf32>
    tpu.vector_store %arg5[%25, %c0_18], %24 {strides = array<i32>} : memref<64x128xf32, #tpu.memory_space<vmem>>, vector<8x128xf32>,
    %c2_i32 = arith.constant 2 : i32
    %c8_i32_19 = arith.constant 8 : i32
    %27 = arith.muli %c2_i32, %c8_i32_19 : i32
    %28 = tpu.assume_multiple %27, 8 : i32
    %c1_i32_20 = arith.constant 1 : i32
    %29 = arith.subi %c2_i32, %c1_i32_20 : i32
    %c8_i32_21 = arith.constant 8 : i32
    %30 = arith.muli %29, %c8_i32_21 : i32
    %31 = tpu.assume_multiple %30, 8 : i32
    %32 = arith.index_cast %28 : i32 to index
    %c0_22 = arith.constant 0 : index
    %33 = vector.load %arg5[%32, %c0_22] : memref<64x128xf32, #tpu.memory_space<vmem>>, vector<8x128xf32>
    %34 = tpu.concatenate %33, %7 in 1 : vector<8x128xf32>, vector<8x128xf32> -> vector<8x256xf32>
    %c0_23 = arith.constant 0 : index
    %c0_24 = arith.constant 0 : index
    %35 = vector.load %arg3[%c0_23, %c0_24] : memref<256x256xf32, #tpu.memory_space<vmem>>, vector<256x256xf32>
    %cst_25 = arith.constant dense<0.000000e+00> : vector<8x256xf32>
    %36 = tpu.matmul %23, %35, %cst_25 {dimension_numbers = #tpu.dot_dimension_numbers<[1], [0], [0], [1], [0, 0, 1, 1], [], []>} : vector<8x256xf32>, vector<256x256xf32>, vector<8x256xf32> -> vector<8x256xf32>
    %37 = arith.addf %36, %34 : vector<8x256xf32>
    %38 = math.tanh %37 : vector<8x256xf32>
    %39 = vector.extract_strided_slice %38 {offsets = [0, 128], sizes = [8, 128], strides = [1, 1]} : vector<8x256xf32> to vector<8x128xf32>
    %40 = arith.index_cast %31 : i32 to index
    %c0_26 = arith.constant 0 : index
    %41 = vector.load %arg5[%40, %c0_26] : memref<64x128xf32, #tpu.memory_space<vmem>>, vector<8x128xf32>
    tpu.vector_store %arg5[%40, %c0_26], %39 {strides = array<i32>} : memref<64x128xf32, #tpu.memory_space<vmem>>, vector<8x128xf32>,
    %c3_i32 = arith.constant 3 : i32
    %c8_i32_27 = arith.constant 8 : i32
    %42 = arith.muli %c3_i32, %c8_i32_27 : i32
    %43 = tpu.assume_multiple %42, 8 : i32
    %c1_i32_28 = arith.constant 1 : i32
    %44 = arith.subi %c3_i32, %c1_i32_28 : i32
    %c8_i32_29 = arith.constant 8 : i32
    %45 = arith.muli %44, %c8_i32_29 : i32
    %46 = tpu.assume_multiple %45, 8 : i32
    %47 = arith.index_cast %43 : i32 to index
    %c0_30 = arith.constant 0 : index
    %48 = vector.load %arg5[%47, %c0_30] : memref<64x128xf32, #tpu.memory_space<vmem>>, vector<8x128xf32>
    %49 = tpu.concatenate %48, %7 in 1 : vector<8x128xf32>, vector<8x128xf32> -> vector<8x256xf32>
    %c0_31 = arith.constant 0 : index
    %c0_32 = arith.constant 0 : index
    %50 = vector.load %arg3[%c0_31, %c0_32] : memref<256x256xf32, #tpu.memory_space<vmem>>, vector<256x256xf32>
    %cst_33 = arith.constant dense<0.000000e+00> : vector<8x256xf32>
    %51 = tpu.matmul %38, %50, %cst_33 {dimension_numbers = #tpu.dot_dimension_numbers<[1], [0], [0], [1], [0, 0, 1, 1], [], []>} : vector<8x256xf32>, vector<256x256xf32>, vector<8x256xf32> -> vector<8x256xf32>
    %52 = arith.addf %51, %49 : vector<8x256xf32>
    %53 = math.tanh %52 : vector<8x256xf32>
    %54 = vector.extract_strided_slice %53 {offsets = [0, 128], sizes = [8, 128], strides = [1, 1]} : vector<8x256xf32> to vector<8x128xf32>
    %55 = arith.index_cast %46 : i32 to index
    %c0_34 = arith.constant 0 : index
    %56 = vector.load %arg5[%55, %c0_34] : memref<64x128xf32, #tpu.memory_space<vmem>>, vector<8x128xf32>
    tpu.vector_store %arg5[%55, %c0_34], %54 {strides = array<i32>} : memref<64x128xf32, #tpu.memory_space<vmem>>, vector<8x128xf32>,
    %c4_i32 = arith.constant 4 : i32
    %c8_i32_35 = arith.constant 8 : i32
    %57 = arith.muli %c4_i32, %c8_i32_35 : i32
    %58 = tpu.assume_multiple %57, 8 : i32
    %c1_i32_36 = arith.constant 1 : i32
    %59 = arith.subi %c4_i32, %c1_i32_36 : i32
    %c8_i32_37 = arith.constant 8 : i32
    %60 = arith.muli %59, %c8_i32_37 : i32
    %61 = tpu.assume_multiple %60, 8 : i32
    %62 = arith.index_cast %58 : i32 to index
    %c0_38 = arith.constant 0 : index
    %63 = vector.load %arg5[%62, %c0_38] : memref<64x128xf32, #tpu.memory_space<vmem>>, vector<8x128xf32>
    %64 = tpu.concatenate %63, %7 in 1 : vector<8x128xf32>, vector<8x128xf32> -> vector<8x256xf32>
    %c0_39 = arith.constant 0 : index
    %c0_40 = arith.constant 0 : index
    %65 = vector.load %arg3[%c0_39, %c0_40] : memref<256x256xf32, #tpu.memory_space<vmem>>, vector<256x256xf32>
    %cst_41 = arith.constant dense<0.000000e+00> : vector<8x256xf32>
    %66 = tpu.matmul %53, %65, %cst_41 {dimension_numbers = #tpu.dot_dimension_numbers<[1], [0], [0], [1], [0, 0, 1, 1], [], []>} : vector<8x256xf32>, vector<256x256xf32>, vector<8x256xf32> -> vector<8x256xf32>
    %67 = arith.addf %66, %64 : vector<8x256xf32>
    %68 = math.tanh %67 : vector<8x256xf32>
    %69 = vector.extract_strided_slice %68 {offsets = [0, 128], sizes = [8, 128], strides = [1, 1]} : vector<8x256xf32> to vector<8x128xf32>
    %70 = arith.index_cast %61 : i32 to index
    %c0_42 = arith.constant 0 : index
    %71 = vector.load %arg5[%70, %c0_42] : memref<64x128xf32, #tpu.memory_space<vmem>>, vector<8x128xf32>
    tpu.vector_store %arg5[%70, %c0_42], %69 {strides = array<i32>} : memref<64x128xf32, #tpu.memory_space<vmem>>, vector<8x128xf32>,
    %c5_i32 = arith.constant 5 : i32
    %c8_i32_43 = arith.constant 8 : i32
    %72 = arith.muli %c5_i32, %c8_i32_43 : i32
    %73 = tpu.assume_multiple %72, 8 : i32
    %c1_i32_44 = arith.constant 1 : i32
    %74 = arith.subi %c5_i32, %c1_i32_44 : i32
    %c8_i32_45 = arith.constant 8 : i32
    %75 = arith.muli %74, %c8_i32_45 : i32
    %76 = tpu.assume_multiple %75, 8 : i32
    %77 = arith.index_cast %73 : i32 to index
    %c0_46 = arith.constant 0 : index
    %78 = vector.load %arg5[%77, %c0_46] : memref<64x128xf32, #tpu.memory_space<vmem>>, vector<8x128xf32>
    %79 = tpu.concatenate %78, %7 in 1 : vector<8x128xf32>, vector<8x128xf32> -> vector<8x256xf32>
    %c0_47 = arith.constant 0 : index
    %c0_48 = arith.constant 0 : index
    %80 = vector.load %arg3[%c0_47, %c0_48] : memref<256x256xf32, #tpu.memory_space<vmem>>, vector<256x256xf32>
    %cst_49 = arith.constant dense<0.000000e+00> : vector<8x256xf32>
    %81 = tpu.matmul %68, %80, %cst_49 {dimension_numbers = #tpu.dot_dimension_numbers<[1], [0], [0], [1], [0, 0, 1, 1], [], []>} : vector<8x256xf32>, vector<256x256xf32>, vector<8x256xf32> -> vector<8x256xf32>
    %82 = arith.addf %81, %79 : vector<8x256xf32>
    %83 = math.tanh %82 : vector<8x256xf32>
    %84 = vector.extract_strided_slice %83 {offsets = [0, 128], sizes = [8, 128], strides = [1, 1]} : vector<8x256xf32> to vector<8x128xf32>
    %85 = arith.index_cast %76 : i32 to index
    %c0_50 = arith.constant 0 : index
    %86 = vector.load %arg5[%85, %c0_50] : memref<64x128xf32, #tpu.memory_space<vmem>>, vector<8x128xf32>
    tpu.vector_store %arg5[%85, %c0_50], %84 {strides = array<i32>} : memref<64x128xf32, #tpu.memory_space<vmem>>, vector<8x128xf32>,
    %c6_i32 = arith.constant 6 : i32
    %c8_i32_51 = arith.constant 8 : i32
    %87 = arith.muli %c6_i32, %c8_i32_51 : i32
    %88 = tpu.assume_multiple %87, 8 : i32
    %c1_i32_52 = arith.constant 1 : i32
    %89 = arith.subi %c6_i32, %c1_i32_52 : i32
    %c8_i32_53 = arith.constant 8 : i32
    %90 = arith.muli %89, %c8_i32_53 : i32
    %91 = tpu.assume_multiple %90, 8 : i32
    %92 = arith.index_cast %88 : i32 to index
    %c0_54 = arith.constant 0 : index
    %93 = vector.load %arg5[%92, %c0_54] : memref<64x128xf32, #tpu.memory_space<vmem>>, vector<8x128xf32>
    %94 = tpu.concatenate %93, %7 in 1 : vector<8x128xf32>, vector<8x128xf32> -> vector<8x256xf32>
    %c0_55 = arith.constant 0 : index
    %c0_56 = arith.constant 0 : index
    %95 = vector.load %arg3[%c0_55, %c0_56] : memref<256x256xf32, #tpu.memory_space<vmem>>, vector<256x256xf32>
    %cst_57 = arith.constant dense<0.000000e+00> : vector<8x256xf32>
    %96 = tpu.matmul %83, %95, %cst_57 {dimension_numbers = #tpu.dot_dimension_numbers<[1], [0], [0], [1], [0, 0, 1, 1], [], []>} : vector<8x256xf32>, vector<256x256xf32>, vector<8x256xf32> -> vector<8x256xf32>
    %97 = arith.addf %96, %94 : vector<8x256xf32>
    %98 = math.tanh %97 : vector<8x256xf32>
    %99 = vector.extract_strided_slice %98 {offsets = [0, 128], sizes = [8, 128], strides = [1, 1]} : vector<8x256xf32> to vector<8x128xf32>
    %100 = arith.index_cast %91 : i32 to index
    %c0_58 = arith.constant 0 : index
    %101 = vector.load %arg5[%100, %c0_58] : memref<64x128xf32, #tpu.memory_space<vmem>>, vector<8x128xf32>
    tpu.vector_store %arg5[%100, %c0_58], %99 {strides = array<i32>} : memref<64x128xf32, #tpu.memory_space<vmem>>, vector<8x128xf32>,
    %c7_i32 = arith.constant 7 : i32
    %c8_i32_59 = arith.constant 8 : i32
    %102 = arith.muli %c7_i32, %c8_i32_59 : i32
    %103 = tpu.assume_multiple %102, 8 : i32
    %c1_i32_60 = arith.constant 1 : i32
    %104 = arith.subi %c7_i32, %c1_i32_60 : i32
    %c8_i32_61 = arith.constant 8 : i32
    %105 = arith.muli %104, %c8_i32_61 : i32
    %106 = tpu.assume_multiple %105, 8 : i32
    %107 = arith.index_cast %103 : i32 to index
    %c0_62 = arith.constant 0 : index
    %108 = vector.load %arg5[%107, %c0_62] : memref<64x128xf32, #tpu.memory_space<vmem>>, vector<8x128xf32>
    %109 = tpu.concatenate %108, %7 in 1 : vector<8x128xf32>, vector<8x128xf32> -> vector<8x256xf32>
    %c0_63 = arith.constant 0 : index
    %c0_64 = arith.constant 0 : index
    %110 = vector.load %arg3[%c0_63, %c0_64] : memref<256x256xf32, #tpu.memory_space<vmem>>, vector<256x256xf32>
    %cst_65 = arith.constant dense<0.000000e+00> : vector<8x256xf32>
    %111 = tpu.matmul %98, %110, %cst_65 {dimension_numbers = #tpu.dot_dimension_numbers<[1], [0], [0], [1], [0, 0, 1, 1], [], []>} : vector<8x256xf32>, vector<256x256xf32>, vector<8x256xf32> -> vector<8x256xf32>
    %112 = arith.addf %111, %109 : vector<8x256xf32>
    %113 = math.tanh %112 : vector<8x256xf32>
    %114 = vector.extract_strided_slice %113 {offsets = [0, 128], sizes = [8, 128], strides = [1, 1]} : vector<8x256xf32> to vector<8x128xf32>
    %115 = arith.index_cast %106 : i32 to index
    %c0_66 = arith.constant 0 : index
    %116 = vector.load %arg5[%115, %c0_66] : memref<64x128xf32, #tpu.memory_space<vmem>>, vector<8x128xf32>
    tpu.vector_store %arg5[%115, %c0_66], %114 {strides = array<i32>} : memref<64x128xf32, #tpu.memory_space<vmem>>, vector<8x128xf32>,
    %c7_i32_67 = arith.constant 7 : i32
    %c0_68 = arith.constant 0 : index
    %c0_69 = arith.constant 0 : index
    %117 = vector.load %arg3[%c0_68, %c0_69] : memref<256x256xf32, #tpu.memory_space<vmem>>, vector<256x256xf32>
    %cst_70 = arith.constant dense<0.000000e+00> : vector<8x256xf32>
    %118 = tpu.matmul %113, %117, %cst_70 {dimension_numbers = #tpu.dot_dimension_numbers<[1], [0], [0], [1], [0, 0, 1, 1], [], []>} : vector<8x256xf32>, vector<256x256xf32>, vector<8x256xf32> -> vector<8x256xf32>
    %119 = vector.extract_strided_slice %118 {offsets = [0, 128], sizes = [8, 128], strides = [1, 1]} : vector<8x256xf32> to vector<8x128xf32>
    %120 = arith.addf %119, %7 : vector<8x128xf32>
    %121 = math.tanh %120 : vector<8x128xf32>
    %c56 = arith.constant 56 : index
    %c0_71 = arith.constant 0 : index
    %122 = vector.load %arg5[%c56, %c0_71] : memref<64x128xf32, #tpu.memory_space<vmem>>, vector<8x128xf32>
    tpu.vector_store %arg5[%c56, %c0_71], %121 {strides = array<i32>} : memref<64x128xf32, #tpu.memory_space<vmem>>, vector<8x128xf32>,
    %123 = vector.extract_strided_slice %113 {offsets = [0, 0], sizes = [8, 128], strides = [1, 1]} : vector<8x256xf32> to vector<8x128xf32>
    %c0_72 = arith.constant 0 : index
    %c0_73 = arith.constant 0 : index
    %c0_74 = arith.constant 0 : index
    %124 = vector.load %arg6[%c0_72, %c0_73, %c0_74] : memref<2x8x128xf32, #tpu.memory_space<vmem>>, vector<1x8x128xf32>
    %125 = vector.shape_cast %124 : vector<1x8x128xf32> to vector<8x128xf32>
    %126 = vector.shape_cast %123 : vector<8x128xf32> to vector<1x8x128xf32>
    tpu.vector_store %arg6[%c0_72, %c0_73, %c0_74], %126 {strides = array<i32>} : memref<2x8x128xf32, #tpu.memory_space<vmem>>, vector<1x8x128xf32>,
    %c1 = arith.constant 1 : index
    %c0_75 = arith.constant 0 : index
    %c0_76 = arith.constant 0 : index
    %127 = vector.load %arg6[%c1, %c0_75, %c0_76] : memref<2x8x128xf32, #tpu.memory_space<vmem>>, vector<1x8x128xf32>
    %128 = vector.shape_cast %127 : vector<1x8x128xf32> to vector<8x128xf32>
    %129 = vector.shape_cast %121 : vector<8x128xf32> to vector<1x8x128xf32>
    tpu.vector_store %arg6[%c1, %c0_75, %c0_76], %129 {strides = array<i32>} : memref<2x8x128xf32, #tpu.memory_space<vmem>>, vector<1x8x128xf32>,
    return
  }
}

</mosaic_0001>

<bundles_post_ra>
// kernel: tpu_custom_call.1
= control target key start
LH: loop header
LB: loop body
LE: loop exit
PB: predicated region body
PF: predicated region fallthrough
CT: control target
= control target key end

     0   :  { %12 = vsyncpa [#allocation3], 0  ;;  %s2573_s0 = inlined_call_operand.vmem [shape: f32[64,32], index: 0, kind: input, shape index: {}]   ;;  %s2574_s1 = inlined_call_operand.vmem [shape: f32[32,128], index: 1, kind: input, shape index: {}]   ;;  %s2575_s2 = inlined_call_operand.vmem [shape: f32[1,128], index: 2, kind: input, shape index: {}]   ;;  %s2576_s3 = inlined_call_operand.hbm [shape: f32[256,256], index: 3, kind: input, shape index: {}]   ;;  %s2577_s4 = inlined_call_operand.vmem [shape: f32[8,128], index: 4, kind: input, shape index: {}]   ;;  %s2578_s5 = inlined_call_operand.hbm [shape: f32[64,128], index: 5, kind: output, shape index: {0}]   ;;  %s2579_s6 = inlined_call_operand.hbm [shape: f32[2,8,128], index: 6, kind: output, shape index: {1}]  }
   0x1   :  { %13 = vsyncpa [#allocation4], 0 }
   0x2   :  { %14 = vsyncpa [#allocation7], 0  ;;  %s2024_s21 = smov [#allocation2]   ;;  %s1952_s25 = scalar_lea.hbm %s2576_s3, 8192 }
   0x3   :  { %s26_s22 = sshll.u32 %s2024_s21, 4  ;;  %p1953_p0 = scmp.ne.s32.totalorder %s2576_s3, %s1952_s25  ;;  %s27_s22 = int_to_ptr.vmem [resolvable:$true] %s26_s22 }
   0x4   :  { %p1956_p1 = scmp.lt.u32.totalorder %s1952_s25, %s2576_s3 }
   0x6   :  { %p1958_p2 = pnand %p1956_p1, %p1953_p0 }
   0x8   :  { %1961 = shalt.err (!%p1958_p2)
}
   0x9   :  { %s1962_s30 = scalar_lea.vmem %s27_s22, 8192  ;;  %p1967_p4 = scmp.lt.s32.totalorder %s27_s22, %s27_s22 }
   0xa   :  { %p1963_p3 = scmp.ne.s32.totalorder %s27_s22, %s1962_s30  ;;  %p1968_p5 = scmp.lt.s32.totalorder %s1962_s30, %s1962_s30 }
   0xc   :  { %p1969_p6 = por %p1968_p5, %p1967_p4 }
   0xe   :  { %p1970_p7 = pnand %p1969_p6, %p1963_p3 }
  0x10   :  { %1973 = shalt.err (!%p1970_p7)
}
  0x11   :  { %s2025_s7 = smov 256   ;;  %s2026_s8 = smov 16  }
  0x12   :  { %32 = dma.hbm_to_vmem [thread:$0]  %s2576_s3, 8192, %s27_s22, [#allocation3], %s2025_s7, %s2025_s7, %s2026_s8  }
  0x13   :  { %2018 = dma.done.wait [#allocation3], 8192  }
  0x14   :  { %2019 = vsyncadd [#allocation3], 4294959104  ;;  %vm57_vm0 = vcmask 261120   ;;  %v46_v0 = vld [vmem:[%s2574_s1] sm:$0xff]  ;;  %v47_v1 = vld [vmem:[%s2574_s1 + $0x8] sm:$0xff]  ;;  %s2029_s12 = smov [#allocation6]  }
  0x15   :  { %v48_v2 = vld [vmem:[%s2574_s1 + $0x10] sm:$0xff]  ;;  %v1392_v3 = vpack.c.bf16 %v47_v1, %v46_v0  ;;  %v49_v4 = vld [vmem:[%s2574_s1 + $0x18] sm:$0xff]  ;;  %v38_v5 = vld [vmem:[%s2573_s0] sm:$0xff]  ;;  %s1335_s13 = sshll.u32 %s2029_s12, 4  ;;  %s2542_s13 = int_to_ptr.vmem [resolvable:$true] %s1335_s13 }
  0x16   :  { %v1396_v6 = vpack.c.bf16 %v49_v4, %v48_v2  ;;  %1380 = vmatprep.mubr.msk.f32.mxu0 %vm57_vm0, %v38_v5  ;;  %v201_v7 = vld [vmem:[#allocation2 + $0x8] sm:$0xff]  ;;  %v203_v8 = vld [vmem:[#allocation2 + $0x18] sm:$0xff]  ;;  %v200_v9 = vld [vmem:[#allocation2] sm:$0xff] }
  0x17   :  { %1393 = vmatprep.subr.bf16.mxu0 %v1392_v3  ;;  %v2095_v10 = vpack.c.bf16 %v203_v8, %v201_v7  ;;  %v202_v11 = vld [vmem:[#allocation2 + $0x10] sm:$0xff]  ;;  %v205_v12 = vld [vmem:[#allocation2 + $0x28] sm:$0xff]  ;;  %v207_v13 = vld [vmem:[#allocation2 + $0x38] sm:$0xff] }
  0x18   :  { %1395 = vmatpush3.bf16.msra.mxu0 %v1392_v3  ;;  %v2097_v14 = vpack.c.bf16 %v202_v11, %v200_v9  ;;  %v2099_v15 = vpack.c.bf16 %v207_v13, %v205_v12  ;;  %v204_v16 = vld [vmem:[#allocation2 + $0x20] sm:$0xff]  ;;  %v206_v17 = vld [vmem:[#allocation2 + $0x30] sm:$0xff]  ;;  %v209_v18 = vld [vmem:[#allocation2 + $0x48] sm:$0xff] }
  0x19   :  { %1397 = vmatprep.subr.bf16.mxu0 %v1396_v6  ;;  %1401 = vmatprep.subr.bf16.mxu1 %v2095_v10  ;;  %v211_v19 = vld [vmem:[#allocation2 + $0x58] sm:$0xff]  ;;  %v2103_v20 = vpack.c.bf16 %v206_v17, %v204_v16  ;;  %v208_v22 = vld [vmem:[#allocation2 + $0x40] sm:$0xff]  ;;  %v210_v23 = vld [vmem:[#allocation2 + $0x50] sm:$0xff] }
  0x1a   :  { %1403 = vmatpush1.bf16.msra.mxu1 %v2097_v14  ;;  %v2106_v21 = vpack.c.bf16 %v211_v19, %v209_v18  ;;  %v39_v24 = vld [vmem:[%s2573_s0 + $0x8] sm:$0xff]  ;;  %v215_v26 = vld [vmem:[#allocation2 + $0x78] sm:$0xff]  ;;  %v2113_v27 = vpack.c.bf16 %v210_v23, %v208_v22  ;;  %v212_v29 = vld [vmem:[#allocation2 + $0x60] sm:$0xff] }
  0x1b   :  { %1405 = vmatprep.subr.bf16.mxu1 %v2099_v15  ;;  %v213_v25 = vld [vmem:[#allocation2 + $0x68] sm:$0xff]  ;;  %v214_v30 = vld [vmem:[#allocation2 + $0x70] sm:$0xff]  ;;  %v219_v32 = vld [vmem:[#allocation2 + $0x98] sm:$0xff] }
  0x1c   :  { %1399 = vmatpush3.bf16.msra.mxu0 %v1396_v6  ;;  %v2117_v28 = vpack.c.bf16 %v215_v26, %v213_v25  ;;  %v217_v31 = vld [vmem:[#allocation2 + $0x88] sm:$0xff]  ;;  %v2122_v33 = vpack.c.bf16 %v214_v30, %v212_v29  ;;  %v216_v35 = vld [vmem:[#allocation2 + $0x80] sm:$0xff]  ;;  %v218_v36 = vld [vmem:[#allocation2 + $0x90] sm:$0xff] }
  0x1d   :  { %1465 = vmatprep.subr.bf16.mxu0 %v2095_v10  ;;  %v2125_v34 = vpack.c.bf16 %v219_v32, %v217_v31  ;;  %v221_v37 = vld [vmem:[#allocation2 + $0xa8] sm:$0xff]  ;;  %v223_v38 = vld [vmem:[#allocation2 + $0xb8] sm:$0xff]  ;;  %v2130_v39 = vpack.c.bf16 %v218_v36, %v216_v35  ;;  %v220_v41 = vld [vmem:[#allocation2 + $0xa0] sm:$0xff] }
  0x1e   :  { %1407 = vmatpush1.bf16.msra.mxu1 %v2103_v20  ;;  %v2133_v40 = vpack.c.bf16 %v223_v38, %v221_v37  ;;  %v222_v42 = vld [vmem:[#allocation2 + $0xb0] sm:$0xff]  ;;  %v225_v43 = vld [vmem:[#allocation2 + $0xc8] sm:$0xff]  ;;  %v227_v44 = vld [vmem:[#allocation2 + $0xd8] sm:$0xff] }
  0x1f   :  { %1381 = vmatmul.mubr.msk.f32.vlgmr.msra.gmra.mrb[0].mxu0 %vm57_vm0, %v39_v24  ;;  %1409 = vmatprep.subr.bf16.mxu1 %v2106_v21  ;;  %v2138_v45 = vpack.c.bf16 %v222_v42, %v220_v41  ;;  %v2141_v46 = vpack.c.bf16 %v227_v44, %v225_v43  ;;  %v224_v47 = vld [vmem:[#allocation2 + $0xc0] sm:$0xff]  ;;  %v226_v48 = vld [vmem:[#allocation2 + $0xd0] sm:$0xff]  ;;  %v229_v49 = vld [vmem:[#allocation2 + $0xe8] sm:$0xff] }
  0x20   :  { %1467 = vmatpush1.bf16.msra.mxu0 %v2097_v14  ;;  %v231_v50 = vld [vmem:[#allocation2 + $0xf8] sm:$0xff]  ;;  %v2146_v51 = vpack.c.bf16 %v226_v48, %v224_v47  ;;  %v228_v53 = vld [vmem:[#allocation2 + $0xe0] sm:$0xff]  ;;  %v230_v54 = vld [vmem:[#allocation2 + $0xf0] sm:$0xff]  ;;  %v2027_v48 = vmov 0.0  }
  0x21   :  { %1469 = vmatprep.subr.bf16.mxu0 %v2099_v15  ;;  %v2149_v52 = vpack.c.bf16 %v231_v50, %v229_v49  ;;  %v233_v55 = vld [vmem:[#allocation2 + $0x108] sm:$0xff]  ;;  %v235_v56 = vld [vmem:[#allocation2 + $0x118] sm:$0xff]  ;;  %v2154_v57 = vpack.c.bf16 %v230_v54, %v228_v53  ;;  %v232_v59 = vld [vmem:[#allocation2 + $0x100] sm:$0xff]  ;;  %328 = vmatprep.mubr.f32.mxu1 %v2027_v48 }
  0x22   :  { %1411 = vmatpush1.bf16.msra.mxu1 %v2113_v27  ;;  %v2157_v58 = vpack.c.bf16 %v235_v56, %v233_v55  ;;  %v234_v60 = vld [vmem:[#allocation2 + $0x110] sm:$0xff]  ;;  %v237_v61 = vld [vmem:[#allocation2 + $0x128] sm:$0xff]  ;;  %v239_v62 = vld [vmem:[#allocation2 + $0x138] sm:$0xff] }
  0x23   :  { %1413 = vmatprep.subr.bf16.mxu1 %v2117_v28  ;;  %v2162_v63 = vpack.c.bf16 %v234_v60, %v232_v59  ;;  %v2165_v0 = vpack.c.bf16 %v239_v62, %v237_v61  ;;  %v236_v1 = vld [vmem:[#allocation2 + $0x120] sm:$0xff]  ;;  %v238_v2 = vld [vmem:[#allocation2 + $0x130] sm:$0xff]  ;;  %v241_v3 = vld [vmem:[#allocation2 + $0x148] sm:$0xff] }
  0x24   :  { %1471 = vmatpush1.bf16.msra.mxu0 %v2103_v20  ;;  %v243_v4 = vld [vmem:[#allocation2 + $0x158] sm:$0xff]  ;;  %v2170_v5 = vpack.c.bf16 %v238_v2, %v236_v1  ;;  %v240_v7 = vld [vmem:[#allocation2 + $0x140] sm:$0xff]  ;;  %v242_v8 = vld [vmem:[#allocation2 + $0x150] sm:$0xff] }
  0x25   :  { %1473 = vmatprep.subr.bf16.mxu0 %v2106_v21  ;;  %v2173_v6 = vpack.c.bf16 %v243_v4, %v241_v3  ;;  %v2183_v9 = vpack.c.bf16 %v242_v8, %v240_v7  ;;  %v245_v11 = vld [vmem:[#allocation2 + $0x168] sm:$0xff]  ;;  %v247_v12 = vld [vmem:[#allocation2 + $0x178] sm:$0xff]  ;;  %v244_v16 = vld [vmem:[#allocation2 + $0x160] sm:$0xff] }
  0x26   :  { %1415 = vmatpush1.bf16.msra.mxu1 %v2122_v33  ;;  %v2187_v13 = vpack.c.bf16 %v247_v12, %v245_v11  ;;  %v246_v17 = vld [vmem:[#allocation2 + $0x170] sm:$0xff]  ;;  %v249_v19 = vld [vmem:[#allocation2 + $0x188] sm:$0xff]  ;;  %v251_v22 = vld [vmem:[#allocation2 + $0x198] sm:$0xff] }
  0x27   :  { %1417 = vmatprep.subr.bf16.mxu1 %v2125_v34  ;;  %v2189_v18 = vpack.c.bf16 %v246_v17, %v244_v16  ;;  %v2195_v23 = vpack.c.bf16 %v251_v22, %v249_v19  ;;  %v248_v24 = vld [vmem:[#allocation2 + $0x180] sm:$0xff]  ;;  %v250_v25 = vld [vmem:[#allocation2 + $0x190] sm:$0xff]  ;;  %v253_v29 = vld [vmem:[#allocation2 + $0x1a8] sm:$0xff] }
  0x28   :  { %1475 = vmatpush1.bf16.msra.mxu0 %v2113_v27  ;;  %v2197_v26 = vpack.c.bf16 %v250_v25, %v248_v24  ;;  %v255_v30 = vld [vmem:[#allocation2 + $0x1b8] sm:$0xff]  ;;  %v252_v32 = vld [vmem:[#allocation2 + $0x1a0] sm:$0xff]  ;;  %v254_v35 = vld [vmem:[#allocation2 + $0x1b0] sm:$0xff] }
  0x29   :  { %1477 = vmatprep.subr.bf16.mxu0 %v2117_v28  ;;  %v2203_v31 = vpack.c.bf16 %v255_v30, %v253_v29  ;;  %v2205_v36 = vpack.c.bf16 %v254_v35, %v252_v32  ;;  %v257_v37 = vld [vmem:[#allocation2 + $0x1c8] sm:$0xff]  ;;  %v259_v38 = vld [vmem:[#allocation2 + $0x1d8] sm:$0xff]  ;;  %v256_v41 = vld [vmem:[#allocation2 + $0x1c0] sm:$0xff] }
  0x2a   :  { %1419 = vmatpush1.bf16.msra.mxu1 %v2130_v39  ;;  %v2208_v42 = vpack.c.bf16 %v259_v38, %v257_v37  ;;  %v258_v43 = vld [vmem:[#allocation2 + $0x1d0] sm:$0xff]  ;;  %v261_v44 = vld [vmem:[#allocation2 + $0x1e8] sm:$0xff]  ;;  %v263_v47 = vld [vmem:[#allocation2 + $0x1f8] sm:$0xff] }
  0x2b   :  { %1421 = vmatprep.subr.bf16.mxu1 %v2133_v40  ;;  %v2211_v49 = vpack.c.bf16 %v258_v43, %v256_v41  ;;  %v2215_v50 = vpack.c.bf16 %v263_v47, %v261_v44  ;;  %v260_v53 = vld [vmem:[#allocation2 + $0x1e0] sm:$0xff]  ;;  %v262_v54 = vld [vmem:[#allocation2 + $0x1f0] sm:$0xff]  ;;  %v41_v1 = vld [vmem:[%s2573_s0 + $0x18] sm:$0xff] }
  0x2c   :  { %1479 = vmatpush1.bf16.msra.mxu0 %v2122_v33  ;;  %v2220_v55 = vpack.c.bf16 %v262_v54, %v260_v53  ;;  %v2232_v56 = vld [vmem:[%s2575_s2] ss:$0 sm:$0xff]  ;;  %v43_v3 = vld [vmem:[%s2573_s0 + $0x28] sm:$0xff]  ;;  %v44_v4 = vld [vmem:[%s2573_s0 + $0x30] sm:$0xff] }
  0x2d   :  { %1481 = vmatprep.subr.bf16.mxu0 %v2125_v34  ;;  %v42_v2 = vld [vmem:[%s2573_s0 + $0x20] sm:$0xff]  ;;  %v45_v7 = vld [vmem:[%s2573_s0 + $0x38] sm:$0xff]  ;;  %v769_v29 = vld [vmem:[#allocation2 + $0x48] sm:$0xff] }
  0x2e   :  { %1423 = vmatpush1.bf16.msra.mxu1 %v2138_v45  ;;  %v2294_v11 = vld [vmem:[%s2577_s4] sm:$0xff]  ;;  %v771_v30 = vld [vmem:[#allocation2 + $0x58] sm:$0xff]  ;;  %v773_v37 = vld [vmem:[#allocation2 + $0x68] sm:$0xff] }
  0x2f   :  { %1425 = vmatprep.subr.bf16.mxu1 %v2141_v46  ;;  %v764_v25 = vld [vmem:[#allocation2 + $0x20] sm:$0xff]  ;;  %v2350_v32 = vpack.c.bf16 %v771_v30, %v769_v29  ;;  %v775_v38 = vld [vmem:[#allocation2 + $0x78] sm:$0xff]  ;;  %v774_v44 = vld [vmem:[#allocation2 + $0x70] sm:$0xff] }
  0x30   :  { %1483 = vmatpush1.bf16.msra.mxu0 %v2130_v39  ;;  %v768_v35 = vld [vmem:[#allocation2 + $0x40] sm:$0xff]  ;;  %v777_v47 = vld [vmem:[#allocation2 + $0x88] sm:$0xff]  ;;  %v779_v48 = vld [vmem:[#allocation2 + $0x98] sm:$0xff] }
  0x31   :  { %1485 = vmatprep.subr.bf16.mxu0 %v2133_v40  ;;  %v772_v43 = vld [vmem:[#allocation2 + $0x60] sm:$0xff]  ;;  %v778_v54 = vld [vmem:[#allocation2 + $0x90] sm:$0xff] }
  0x32   :  { %1427 = vmatpush1.bf16.msra.mxu1 %v2146_v51  ;;  %v776_v53 = vld [vmem:[#allocation2 + $0x80] sm:$0xff] }
  0x33   :  { %1429 = vmatprep.subr.bf16.mxu1 %v2149_v52 }
  0x34   :  { %1487 = vmatpush1.bf16.msra.mxu0 %v2138_v45 }
  0x35   :  { %1489 = vmatprep.subr.bf16.mxu0 %v2141_v46 }
  0x36   :  { %1431 = vmatpush1.bf16.msra.mxu1 %v2154_v57 }
  0x37   :  { %1433 = vmatprep.subr.bf16.mxu1 %v2157_v58 }
  0x38   :  { %1491 = vmatpush1.bf16.msra.mxu0 %v2146_v51 }
  0x39   :  { %1493 = vmatprep.subr.bf16.mxu0 %v2149_v52 }
  0x3a   :  { %1435 = vmatpush1.bf16.msra.mxu1 %v2162_v63 }
  0x3b   :  { %1437 = vmatprep.subr.bf16.mxu1 %v2165_v0 }
  0x3c   :  { %1495 = vmatpush1.bf16.msra.mxu0 %v2154_v57 }
  0x3d   :  { %1497 = vmatprep.subr.bf16.mxu0 %v2157_v58 }
  0x3e   :  { %1439 = vmatpush1.bf16.msra.mxu1 %v2170_v5 }
  0x3f   :  { %1441 = vmatprep.subr.bf16.mxu1 %v2173_v6 }
  0x40   :  { %1499 = vmatpush1.bf16.msra.mxu0 %v2162_v63 }
  0x41   :  { %1501 = vmatprep.subr.bf16.mxu0 %v2165_v0 }
  0x42   :  { %1443 = vmatpush1.bf16.msra.mxu1 %v2183_v9 }
  0x43   :  { %1445 = vmatprep.subr.bf16.mxu1 %v2187_v13 }
  0x44   :  { %1503 = vmatpush1.bf16.msra.mxu0 %v2170_v5 }
  0x45   :  { %1505 = vmatprep.subr.bf16.mxu0 %v2173_v6 }
  0x46   :  { %1447 = vmatpush1.bf16.msra.mxu1 %v2189_v18 }
  0x47   :  { %1449 = vmatprep.subr.bf16.mxu1 %v2195_v23 }
  0x48   :  { %1507 = vmatpush1.bf16.msra.mxu0 %v2183_v9 }
  0x49   :  { %1509 = vmatprep.subr.bf16.mxu0 %v2187_v13 }
  0x4a   :  { %1451 = vmatpush1.bf16.msra.mxu1 %v2197_v26 }
  0x4b   :  { %1453 = vmatprep.subr.bf16.mxu1 %v2203_v31 }
  0x4c   :  { %1511 = vmatpush1.bf16.msra.mxu0 %v2189_v18 }
  0x4d   :  { %1513 = vmatprep.subr.bf16.mxu0 %v2195_v23 }
  0x4e   :  { %1455 = vmatpush1.bf16.msra.mxu1 %v2205_v36 }
  0x4f   :  { %1457 = vmatprep.subr.bf16.mxu1 %v2208_v42 }
  0x50   :  { %1515 = vmatpush1.bf16.msra.mxu0 %v2197_v26 }
  0x51   :  { %1517 = vmatprep.subr.bf16.mxu0 %v2203_v31 }
  0x52   :  { %1459 = vmatpush1.bf16.msra.mxu1 %v2211_v49 }
  0x53   :  { %1461 = vmatprep.subr.bf16.mxu1 %v2215_v50 }
  0x54   :  { %1519 = vmatpush1.bf16.msra.mxu0 %v2205_v36 }
  0x55   :  { %1521 = vmatprep.subr.bf16.mxu0 %v2208_v42 }
  0x56   :  { %1463 = vmatpush1.bf16.msra.mxu1 %v2220_v55 }
  0x57   :  { %1529 = vmatprep.subr.bf16.mxu1 %v2095_v10 }
  0x58   :  { %1523 = vmatpush1.bf16.msra.mxu0 %v2211_v49 }
  0x59   :  { %1525 = vmatprep.subr.bf16.mxu0 %v2215_v50 }
  0x5c   :  { %1527 = vmatpush1.bf16.msra.mxu0 %v2220_v55 }
  0x5d   :  { %1593 = vmatprep.subr.bf16.mxu0 %v2095_v10  ;;  %v40_v10 = vld [vmem:[%s2573_s0 + $0x10] sm:$0xff]  ;;  %s2028_s0 = smov [#allocation5]  }
  0x5e   :  { %1383 = vmatprep.mubr.msk.f32.mxu0 %vm57_vm0, %v40_v10  ;;  %v782_v10 = vld [vmem:[#allocation2 + $0xb0] sm:$0xff]  ;;  %s1323_s4 = sshll.u32 %s2028_s0, 4  ;;  %s1324_s4 = int_to_ptr.vmem [resolvable:$true] %s1323_s4 }
  0x5f   :  { %1384 = vmatmul.mubr.msk.f32.gmra.mrb[2].mxu0 %vm57_vm0, %v41_v1  ;;  %v785_v1 = vld [vmem:[#allocation2 + $0xc8] sm:$0xff]  ;;  %s1974_s14 = scalar_lea.vmem %s1324_s4, 1024  ;;  %p1979_p9 = scmp.lt.s32.totalorder %s1324_s4, %s1324_s4 }
  0x60   :  { %1386 = vmatprep.mubr.msk.f32.mxu0 %vm57_vm0, %v42_v2  ;;  %v787_v2 = vld [vmem:[#allocation2 + $0xd8] sm:$0xff]  ;;  %p1975_p8 = scmp.ne.s32.totalorder %s1324_s4, %s1974_s14  ;;  %p1980_p10 = scmp.lt.s32.totalorder %s1974_s14, %s1974_s14 }
  0x62   :  { %p1981_p11 = por %p1980_p10, %p1979_p9 }
  0x63   :  { %1387 = vmatmul.mubr.msk.f32.gmra.mrb[4].mxu0 %vm57_vm0, %v43_v3 }
  0x64   :  { %1389 = vmatprep.mubr.msk.f32.mxu0 %vm57_vm0, %v44_v4  ;;  %v2374_v4 = vpack.c.bf16 %v787_v2, %v785_v1  ;;  %v813_v2 = vld [vmem:[#allocation2 + $0x1a8] sm:$0xff]  ;;  %p1982_p12 = pnand %p1981_p11, %p1975_p8 }
  0x67   :  { %1390 = vmatmul.mubr.msk.f32.gmra.mrb[6].mxu0 %vm57_vm0, %v45_v7  ;;  %v784_v7 = vld [vmem:[#allocation2 + $0xc0] sm:$0xff] }
  0xf2   :  { %v1382_v59 = vpop.f32.mrb[0].mxu0 }
  0xf3   :  { %v148_v60 = vpop.f32.mrb[1].mxu0  ;;  %v154_v8 = vadd.f32 %v1382_v59, %v2232_v56  ;;  %v783_v59 = vld [vmem:[#allocation2 + $0xb8] sm:$0xff] }
  0xf4   :  { %v149_v61 = vadd.f32 %v2232_v56, %v148_v60  ;;  %v2365_v60 = vpack.c.bf16 %v778_v54, %v776_v53 }
  0xf6   :  { %1920 = vtanh.f32 %v149_v61 }
 0x100   :  { %v1921_v62 = vpop.eup %1920 }
 0x101   :  { %329 = vmatmul.mubr.f32.vlgmr.msra.gmra.mrb[0].mxu1 %v1921_v62  ;;  %v780_v62 = vld [vmem:[#allocation2 + $0xa0] sm:$0xff] }
 0x102   :  { %1531 = vmatpush1.bf16.msra.mxu1 %v2097_v14  ;;  %v2371_v3 = vpack.c.bf16 %v782_v10, %v780_v62  ;;  %v808_v62 = vld [vmem:[#allocation2 + $0x180] sm:$0xff]  ;;  %v810_v10 = vld [vmem:[#allocation2 + $0x190] sm:$0xff] }
 0x103   :  { %1533 = vmatprep.subr.bf16.mxu1 %v2099_v15  ;;  %v2439_v1 = vpack.c.bf16 %v810_v10, %v808_v62 }
 0x106   :  { %1535 = vmatpush1.bf16.msra.mxu1 %v2103_v20 }
 0x107   :  { %1537 = vmatprep.subr.bf16.mxu1 %v2106_v21 }
 0x10a   :  { %1539 = vmatpush1.bf16.msra.mxu1 %v2113_v27 }
 0x10b   :  { %1541 = vmatprep.subr.bf16.mxu1 %v2117_v28 }
 0x10e   :  { %1543 = vmatpush1.bf16.msra.mxu1 %v2122_v33 }
 0x10f   :  { %1545 = vmatprep.subr.bf16.mxu1 %v2125_v34 }
 0x112   :  { %1547 = vmatpush1.bf16.msra.mxu1 %v2130_v39 }
 0x113   :  { %1549 = vmatprep.subr.bf16.mxu1 %v2133_v40 }
 0x116   :  { %1551 = vmatpush1.bf16.msra.mxu1 %v2138_v45 }
 0x117   :  { %1553 = vmatprep.subr.bf16.mxu1 %v2141_v46 }
 0x11a   :  { %1555 = vmatpush1.bf16.msra.mxu1 %v2146_v51 }
 0x11b   :  { %1557 = vmatprep.subr.bf16.mxu1 %v2149_v52 }
 0x11e   :  { %1559 = vmatpush1.bf16.msra.mxu1 %v2154_v57 }
 0x11f   :  { %1561 = vmatprep.subr.bf16.mxu1 %v2157_v58 }
 0x122   :  { %1563 = vmatpush1.bf16.msra.mxu1 %v2162_v63 }
 0x123   :  { %1565 = vmatprep.subr.bf16.mxu1 %v2165_v0 }
 0x126   :  { %1567 = vmatpush1.bf16.msra.mxu1 %v2170_v5 }
 0x127   :  { %1569 = vmatprep.subr.bf16.mxu1 %v2173_v6 }
 0x12a   :  { %1571 = vmatpush1.bf16.msra.mxu1 %v2183_v9 }
 0x12b   :  { %1573 = vmatprep.subr.bf16.mxu1 %v2187_v13 }
 0x12e   :  { %1575 = vmatpush1.bf16.msra.mxu1 %v2189_v18 }
 0x12f   :  { %1577 = vmatprep.subr.bf16.mxu1 %v2195_v23 }
 0x132   :  { %1579 = vmatpush1.bf16.msra.mxu1 %v2197_v26 }
 0x133   :  { %1581 = vmatprep.subr.bf16.mxu1 %v2203_v31 }
 0x136   :  { %1583 = vmatpush1.bf16.msra.mxu1 %v2205_v36 }
 0x137   :  { %1585 = vmatprep.subr.bf16.mxu1 %v2208_v42 }
 0x13a   :  { %1587 = vmatpush1.bf16.msra.mxu1 %v2211_v49 }
 0x13b   :  { %1589 = vmatprep.subr.bf16.mxu1 %v2215_v50 }
 0x13e   :  { %1591 = vmatpush1.bf16.msra.mxu1 %v2220_v55 }
 0x1d4   :  { %v330_v12 = vpop.f32.mrb[0].mxu1 }
 0x1d5   :  { %v331_v16 = vadd.f32 %v330_v12, %v154_v8  ;;  %v332_v17 = vpop.f32.mrb[1].mxu1  ;;  %v786_v8 = vld [vmem:[#allocation2 + $0xd0] sm:$0xff]  ;;  %v789_v12 = vld [vmem:[#allocation2 + $0xe8] sm:$0xff] }
 0x1d6   :  { %v333_v19 = vadd.f32 %v332_v17, %v2294_v11  ;;  %v2377_v17 = vpack.c.bf16 %v786_v8, %v784_v7  ;;  %v815_v7 = vld [vmem:[#allocation2 + $0x1b8] sm:$0xff] }
 0x1d7   :  { %v2445_v8 = vpack.c.bf16 %v815_v7, %v813_v2 }
 0x1d8   :  { %1922 = vtanh.f32 %v333_v19 }
 0x1d9   :  { %1924 = vtanh.f32 %v331_v16  ;;  %v791_v16 = vld [vmem:[#allocation2 + $0xf8] sm:$0xff] }
 0x1da   :  { %v2380_v19 = vpack.c.bf16 %v791_v16, %v789_v12  ;;  %v812_v12 = vld [vmem:[#allocation2 + $0x1a0] sm:$0xff]  ;;  %v814_v16 = vld [vmem:[#allocation2 + $0x1b0] sm:$0xff] }
 0x1e2   :  { %v1923_v22 = vpop.eup %1922 }
 0x1e3   :  { %v1925_v24 = vpop.eup %1924  ;;  %337 = vst [vmem:[#allocation5] sm:$0xff] %v1923_v22  ;;  %468 = vmatprep.mubr.f32.mxu0 %v1923_v22  ;;  %v788_v22 = vld [vmem:[#allocation2 + $0xe0] sm:$0xff] }
 0x1e4   :  { %469 = vmatmul.mubr.f32.vlgmr.msra.gmra.mrb[8].mxu0 %v1925_v24  ;;  %v790_v24 = vld [vmem:[#allocation2 + $0xf0] sm:$0xff] }
 0x1e5   :  { %1595 = vmatpush1.bf16.msra.mxu0 %v2097_v14  ;;  %v2328_v14 = vpop.f32.mrb[2].mxu0 }
 0x1e6   :  { %1597 = vmatprep.subr.bf16.mxu0 %v2099_v15  ;;  %v158_v15 = vpop.f32.mrb[3].mxu0 }
 0x1e9   :  { %1599 = vmatpush1.bf16.msra.mxu0 %v2103_v20  ;;  %v2330_v20 = vpop.f32.mrb[4].mxu0 }
 0x1ea   :  { %1601 = vmatprep.subr.bf16.mxu0 %v2106_v21  ;;  %v2332_v21 = vpop.f32.mrb[5].mxu0 }
 0x1ed   :  { %1603 = vmatpush1.bf16.msra.mxu0 %v2113_v27  ;;  %v1391_v27 = vpop.f32.mrb[6].mxu0 }
 0x1ee   :  { %1605 = vmatprep.subr.bf16.mxu0 %v2117_v28  ;;  %v184_v28 = vadd.f32 %v1391_v27, %v2232_v56  ;;  %v795_v27 = vld [vmem:[#allocation2 + $0x118] sm:$0xff] }
 0x1f0   :  { %194 = vst [vmem:[#allocation5 + $0x38] sm:$0xff] %v184_v28  ;;  %v2383_v28 = vpack.c.bf16 %v790_v24, %v788_v22  ;;  %v2447_v22 = vpack.c.bf16 %v814_v16, %v812_v12  ;;  %v817_v24 = vld [vmem:[#allocation2 + $0x1c8] sm:$0xff] }
 0x1f1   :  { %1607 = vmatpush1.bf16.msra.mxu0 %v2122_v33  ;;  %v178_v33 = vpop.f32.mrb[7].mxu0 }
 0x1f2   :  { %1609 = vmatprep.subr.bf16.mxu0 %v2125_v34  ;;  %v179_v34 = vadd.f32 %v2232_v56, %v178_v33 }
 0x1f4   :  { %193 = vst [vmem:[#allocation5 + $0x30] sm:$0xff] %v179_v34  ;;  %v792_v34 = vld [vmem:[#allocation2 + $0x100] sm:$0xff] }
 0x1f5   :  { %1611 = vmatpush1.bf16.msra.mxu0 %v2130_v39  ;;  %v159_v39 = vadd.f32 %v2232_v56, %v158_v15  ;;  %v793_v15 = vld [vmem:[#allocation2 + $0x108] sm:$0xff] }
 0x1f6   :  { %1613 = vmatprep.subr.bf16.mxu0 %v2133_v40  ;;  %v2386_v33 = vpack.c.bf16 %v795_v27, %v793_v15  ;;  %v819_v15 = vld [vmem:[#allocation2 + $0x1d8] sm:$0xff] }
 0x1f7   :  { %v2453_v27 = vpack.c.bf16 %v819_v15, %v817_v24 }
 0x1f9   :  { %1615 = vmatpush1.bf16.msra.mxu0 %v2138_v45 }
 0x1fa   :  { %1617 = vmatprep.subr.bf16.mxu0 %v2141_v46 }
 0x1fd   :  { %1619 = vmatpush1.bf16.msra.mxu0 %v2146_v51 }
 0x1fe   :  { %1621 = vmatprep.subr.bf16.mxu0 %v2149_v52 }
 0x201   :  { %1623 = vmatpush1.bf16.msra.mxu0 %v2154_v57 }
 0x202   :  { %1625 = vmatprep.subr.bf16.mxu0 %v2157_v58  ;;  %v761_v58 = vld [vmem:[#allocation2 + $0x8] sm:$0xff] }
 0x205   :  { %1627 = vmatpush1.bf16.msra.mxu0 %v2162_v63  ;;  %v763_v63 = vld [vmem:[#allocation2 + $0x18] sm:$0xff] }
 0x206   :  { %1629 = vmatprep.subr.bf16.mxu0 %v2165_v0  ;;  %v760_v0 = vld [vmem:[#allocation2] sm:$0xff] }
 0x209   :  { %1631 = vmatpush1.bf16.msra.mxu0 %v2170_v5  ;;  %v2338_v5 = vpack.c.bf16 %v763_v63, %v761_v58  ;;  %v801_v58 = vld [vmem:[#allocation2 + $0x148] sm:$0xff]  ;;  %v803_v63 = vld [vmem:[#allocation2 + $0x158] sm:$0xff] }
 0x20a   :  { %1633 = vmatprep.subr.bf16.mxu0 %v2173_v6  ;;  %v762_v6 = vld [vmem:[#allocation2 + $0x10] sm:$0xff] }
 0x20b   :  { %1657 = vmatprep.subr.bf16.mxu1 %v2338_v5 }
 0x20d   :  { %1635 = vmatpush1.bf16.msra.mxu0 %v2183_v9  ;;  %v765_v9 = vld [vmem:[#allocation2 + $0x28] sm:$0xff] }
 0x20e   :  { %1637 = vmatprep.subr.bf16.mxu0 %v2187_v13  ;;  %v767_v13 = vld [vmem:[#allocation2 + $0x38] sm:$0xff] }
 0x211   :  { %1639 = vmatpush1.bf16.msra.mxu0 %v2189_v18  ;;  %v2340_v18 = vpack.c.bf16 %v762_v6, %v760_v0  ;;  %v2398_v6 = vpack.c.bf16 %v803_v63, %v801_v58  ;;  %v820_v58 = vld [vmem:[#allocation2 + $0x1e0] sm:$0xff]  ;;  %v822_v63 = vld [vmem:[#allocation2 + $0x1f0] sm:$0xff] }
 0x212   :  { %1641 = vmatprep.subr.bf16.mxu0 %v2195_v23  ;;  %v2342_v23 = vpack.c.bf16 %v767_v13, %v765_v9  ;;  %v800_v9 = vld [vmem:[#allocation2 + $0x140] sm:$0xff]  ;;  %v802_v13 = vld [vmem:[#allocation2 + $0x150] sm:$0xff] }
 0x213   :  { %v2401_v29 = vpack.c.bf16 %v802_v13, %v800_v9  ;;  %v2463_v9 = vpack.c.bf16 %v822_v63, %v820_v58  ;;  %v169_v13 = vadd.f32 %v2232_v56, %v2332_v21  ;;  %v174_v21 = vadd.f32 %v2330_v20, %v2232_v56 }
 0x215   :  { %1643 = vmatpush1.bf16.msra.mxu0 %v2197_v26  ;;  %v766_v26 = vld [vmem:[#allocation2 + $0x30] sm:$0xff] }
 0x216   :  { %1645 = vmatprep.subr.bf16.mxu0 %v2203_v31  ;;  %v2347_v31 = vpack.c.bf16 %v766_v26, %v764_v25  ;;  %v805_v25 = vld [vmem:[#allocation2 + $0x168] sm:$0xff]  ;;  %v807_v26 = vld [vmem:[#allocation2 + $0x178] sm:$0xff] }
 0x217   :  { %v2404_v30 = vpack.c.bf16 %v807_v26, %v805_v25 }
 0x219   :  { %1647 = vmatpush1.bf16.msra.mxu0 %v2205_v36  ;;  %v770_v36 = vld [vmem:[#allocation2 + $0x50] sm:$0xff] }
 0x21a   :  { %1649 = vmatprep.subr.bf16.mxu0 %v2208_v42  ;;  %v2353_v41 = vpack.c.bf16 %v770_v36, %v768_v35  ;;  %v2356_v42 = vpack.c.bf16 %v775_v38, %v773_v37  ;;  %v804_v35 = vld [vmem:[#allocation2 + $0x160] sm:$0xff]  ;;  %v806_v36 = vld [vmem:[#allocation2 + $0x170] sm:$0xff]  ;;  %v164_v38 = vadd.f32 %v2328_v14, %v2232_v56  ;;  %v809_v14 = vld [vmem:[#allocation2 + $0x188] sm:$0xff] }
 0x21b   :  { %v2407_v37 = vpack.c.bf16 %v806_v36, %v804_v35  ;;  %v899_v56 = vld [vmem:[#allocation5 + $0x30] sm:$0xff] }
 0x21d   :  { %1651 = vmatpush1.bf16.msra.mxu0 %v2211_v49  ;;  %v2359_v49 = vpack.c.bf16 %v774_v44, %v772_v43 }
 0x21e   :  { %1653 = vmatprep.subr.bf16.mxu0 %v2215_v50  ;;  %v2362_v50 = vpack.c.bf16 %v779_v48, %v777_v47 }
 0x221   :  { %1655 = vmatpush1.bf16.msra.mxu0 %v2220_v55  ;;  %v781_v55 = vld [vmem:[#allocation2 + $0xa8] sm:$0xff] }
 0x222   :  { %1721 = vmatprep.subr.bf16.mxu0 %v2338_v5  ;;  %v2368_v61 = vpack.c.bf16 %v783_v59, %v781_v55  ;;  %v811_v55 = vld [vmem:[#allocation2 + $0x198] sm:$0xff] }
 0x223   :  { %v2437_v59 = vpack.c.bf16 %v811_v55, %v809_v14 }
 0x2b7   :  { %v470_v40 = vpop.f32.mrb[8].mxu0 }
 0x2b8   :  { %v471_v45 = vadd.f32 %v470_v40, %v159_v39  ;;  %v472_v46 = vpop.f32.mrb[9].mxu0  ;;  %v794_v39 = vld [vmem:[#allocation2 + $0x110] sm:$0xff]  ;;  %v797_v40 = vld [vmem:[#allocation2 + $0x128] sm:$0xff] }
 0x2b9   :  { %v473_v51 = vadd.f32 %v472_v46, %v2294_v11  ;;  %v2389_v46 = vpack.c.bf16 %v794_v39, %v792_v34  ;;  %v816_v34 = vld [vmem:[#allocation2 + $0x1c0] sm:$0xff]  ;;  %v818_v39 = vld [vmem:[#allocation2 + $0x1d0] sm:$0xff] }
 0x2bb   :  { %1926 = vtanh.f32 %v473_v51 }
 0x2bc   :  { %1928 = vtanh.f32 %v471_v45  ;;  %v799_v45 = vld [vmem:[#allocation2 + $0x138] sm:$0xff] }
 0x2bd   :  { %v2392_v51 = vpack.c.bf16 %v799_v45, %v797_v40  ;;  %v2455_v40 = vpack.c.bf16 %v818_v39, %v816_v34  ;;  %v821_v45 = vld [vmem:[#allocation2 + $0x1e8] sm:$0xff] }
 0x2c5   :  { %v1927_v52 = vpop.eup %1926 }
 0x2c6   :  { %v1929_v57 = vpop.eup %1928  ;;  %477 = vst [vmem:[#allocation5 + $0x8] sm:$0xff] %v1927_v52  ;;  %608 = vmatprep.mubr.f32.mxu1 %v1927_v52  ;;  %v796_v52 = vld [vmem:[#allocation2 + $0x120] sm:$0xff] }
 0x2c7   :  { %609 = vmatmul.mubr.f32.vlgmr.msra.gmra.mrb[2].mxu1 %v1929_v57  ;;  %v798_v57 = vld [vmem:[#allocation2 + $0x130] sm:$0xff] }
 0x2c8   :  { %1659 = vmatpush1.bf16.msra.mxu1 %v2340_v18  ;;  %v2395_v0 = vpack.c.bf16 %v798_v57, %v796_v52  ;;  %v823_v52 = vld [vmem:[#allocation2 + $0x1f8] sm:$0xff] }
 0x2c9   :  { %1661 = vmatprep.subr.bf16.mxu1 %v2342_v23  ;;  %v2461_v57 = vpack.c.bf16 %v823_v52, %v821_v45 }
 0x2cc   :  { %1663 = vmatpush1.bf16.msra.mxu1 %v2347_v31 }
 0x2cd   :  { %1665 = vmatprep.subr.bf16.mxu1 %v2350_v32 }
 0x2d0   :  { %1667 = vmatpush1.bf16.msra.mxu1 %v2353_v41 }
 0x2d1   :  { %1669 = vmatprep.subr.bf16.mxu1 %v2356_v42 }
 0x2d4   :  { %1671 = vmatpush1.bf16.msra.mxu1 %v2359_v49 }
 0x2d5   :  { %1673 = vmatprep.subr.bf16.mxu1 %v2362_v50 }
 0x2d8   :  { %1675 = vmatpush1.bf16.msra.mxu1 %v2365_v60 }
 0x2d9   :  { %1677 = vmatprep.subr.bf16.mxu1 %v2368_v61 }
 0x2dc   :  { %1679 = vmatpush1.bf16.msra.mxu1 %v2371_v3 }
 0x2dd   :  { %1681 = vmatprep.subr.bf16.mxu1 %v2374_v4 }
 0x2e0   :  { %1683 = vmatpush1.bf16.msra.mxu1 %v2377_v17 }
 0x2e1   :  { %1685 = vmatprep.subr.bf16.mxu1 %v2380_v19 }
 0x2e4   :  { %1687 = vmatpush1.bf16.msra.mxu1 %v2383_v28 }
 0x2e5   :  { %1689 = vmatprep.subr.bf16.mxu1 %v2386_v33 }
 0x2e8   :  { %1691 = vmatpush1.bf16.msra.mxu1 %v2389_v46 }
 0x2e9   :  { %1693 = vmatprep.subr.bf16.mxu1 %v2392_v51 }
 0x2ec   :  { %1695 = vmatpush1.bf16.msra.mxu1 %v2395_v0 }
 0x2ed   :  { %1697 = vmatprep.subr.bf16.mxu1 %v2398_v6 }
 0x2f0   :  { %1699 = vmatpush1.bf16.msra.mxu1 %v2401_v29 }
 0x2f1   :  { %1701 = vmatprep.subr.bf16.mxu1 %v2404_v30 }
 0x2f4   :  { %1703 = vmatpush1.bf16.msra.mxu1 %v2407_v37 }
 0x2f5   :  { %1705 = vmatprep.subr.bf16.mxu1 %v2437_v59 }
 0x2f8   :  { %1707 = vmatpush1.bf16.msra.mxu1 %v2439_v1 }
 0x2f9   :  { %1709 = vmatprep.subr.bf16.mxu1 %v2445_v8 }
 0x2fc   :  { %1711 = vmatpush1.bf16.msra.mxu1 %v2447_v22 }
 0x2fd   :  { %1713 = vmatprep.subr.bf16.mxu1 %v2453_v27 }
 0x300   :  { %1715 = vmatpush1.bf16.msra.mxu1 %v2455_v40 }
 0x301   :  { %1717 = vmatprep.subr.bf16.mxu1 %v2461_v57 }
 0x304   :  { %1719 = vmatpush1.bf16.msra.mxu1 %v2463_v9 }
 0x305   :  { %1785 = vmatprep.subr.bf16.mxu1 %v2338_v5 }
 0x39a   :  { %v610_v43 = vpop.f32.mrb[2].mxu1 }
 0x39b   :  { %v611_v44 = vadd.f32 %v610_v43, %v164_v38  ;;  %v612_v47 = vpop.f32.mrb[3].mxu1 }
 0x39c   :  { %v613_v48 = vadd.f32 %v612_v47, %v2294_v11 }
 0x39e   :  { %1930 = vtanh.f32 %v613_v48 }
 0x39f   :  { %1932 = vtanh.f32 %v611_v44 }
 0x3a8   :  { %v1931_v53 = vpop.eup %1930 }
 0x3a9   :  { %v1933_v54 = vpop.eup %1932  ;;  %617 = vst [vmem:[#allocation5 + $0x10] sm:$0xff] %v1931_v53  ;;  %748 = vmatprep.mubr.f32.mxu0 %v1931_v53 }
 0x3aa   :  { %749 = vmatmul.mubr.f32.vlgmr.msra.gmra.mrb[10].mxu0 %v1933_v54 }
 0x3ab   :  { %1723 = vmatpush1.bf16.msra.mxu0 %v2340_v18 }
 0x3ac   :  { %1725 = vmatprep.subr.bf16.mxu0 %v2342_v23 }
 0x3af   :  { %1727 = vmatpush1.bf16.msra.mxu0 %v2347_v31 }
 0x3b0   :  { %1729 = vmatprep.subr.bf16.mxu0 %v2350_v32 }
 0x3b3   :  { %1731 = vmatpush1.bf16.msra.mxu0 %v2353_v41 }
 0x3b4   :  { %1733 = vmatprep.subr.bf16.mxu0 %v2356_v42 }
 0x3b7   :  { %1735 = vmatpush1.bf16.msra.mxu0 %v2359_v49 }
 0x3b8   :  { %1737 = vmatprep.subr.bf16.mxu0 %v2362_v50 }
 0x3bb   :  { %1739 = vmatpush1.bf16.msra.mxu0 %v2365_v60 }
 0x3bc   :  { %1741 = vmatprep.subr.bf16.mxu0 %v2368_v61 }
 0x3bf   :  { %1743 = vmatpush1.bf16.msra.mxu0 %v2371_v3 }
 0x3c0   :  { %1745 = vmatprep.subr.bf16.mxu0 %v2374_v4 }
 0x3c3   :  { %1747 = vmatpush1.bf16.msra.mxu0 %v2377_v17 }
 0x3c4   :  { %1749 = vmatprep.subr.bf16.mxu0 %v2380_v19 }
 0x3c7   :  { %1751 = vmatpush1.bf16.msra.mxu0 %v2383_v28 }
 0x3c8   :  { %1753 = vmatprep.subr.bf16.mxu0 %v2386_v33 }
 0x3cb   :  { %1755 = vmatpush1.bf16.msra.mxu0 %v2389_v46 }
 0x3cc   :  { %1757 = vmatprep.subr.bf16.mxu0 %v2392_v51 }
 0x3cf   :  { %1759 = vmatpush1.bf16.msra.mxu0 %v2395_v0 }
 0x3d0   :  { %1761 = vmatprep.subr.bf16.mxu0 %v2398_v6 }
 0x3d3   :  { %1763 = vmatpush1.bf16.msra.mxu0 %v2401_v29 }
 0x3d4   :  { %1765 = vmatprep.subr.bf16.mxu0 %v2404_v30 }
 0x3d7   :  { %1767 = vmatpush1.bf16.msra.mxu0 %v2407_v37 }
 0x3d8   :  { %1769 = vmatprep.subr.bf16.mxu0 %v2437_v59 }
 0x3db   :  { %1771 = vmatpush1.bf16.msra.mxu0 %v2439_v1 }
 0x3dc   :  { %1773 = vmatprep.subr.bf16.mxu0 %v2445_v8 }
 0x3df   :  { %1775 = vmatpush1.bf16.msra.mxu0 %v2447_v22 }
 0x3e0   :  { %1777 = vmatprep.subr.bf16.mxu0 %v2453_v27 }
 0x3e3   :  { %1779 = vmatpush1.bf16.msra.mxu0 %v2455_v40 }
 0x3e4   :  { %1781 = vmatprep.subr.bf16.mxu0 %v2461_v57 }
 0x3e7   :  { %1783 = vmatpush1.bf16.msra.mxu0 %v2463_v9 }
 0x3e8   :  { %1849 = vmatprep.subr.bf16.mxu0 %v2338_v5 }
 0x47d   :  { %v750_v25 = vpop.f32.mrb[10].mxu0 }
 0x47e   :  { %v751_v26 = vadd.f32 %v750_v25, %v169_v13  ;;  %v752_v35 = vpop.f32.mrb[11].mxu0 }
 0x47f   :  { %v753_v36 = vadd.f32 %v752_v35, %v2294_v11 }
 0x481   :  { %1934 = vtanh.f32 %v753_v36 }
 0x482   :  { %1936 = vtanh.f32 %v751_v26 }
 0x48b   :  { %v1935_v38 = vpop.eup %1934 }
 0x48c   :  { %v1937_v43 = vpop.eup %1936  ;;  %757 = vst [vmem:[#allocation5 + $0x18] sm:$0xff] %v1935_v38  ;;  %888 = vmatprep.mubr.f32.mxu1 %v1935_v38 }
 0x48d   :  { %889 = vmatmul.mubr.f32.vlgmr.msra.gmra.mrb[4].mxu1 %v1937_v43 }
 0x48e   :  { %1787 = vmatpush1.bf16.msra.mxu1 %v2340_v18 }
 0x48f   :  { %1789 = vmatprep.subr.bf16.mxu1 %v2342_v23 }
 0x492   :  { %1791 = vmatpush1.bf16.msra.mxu1 %v2347_v31 }
 0x493   :  { %1793 = vmatprep.subr.bf16.mxu1 %v2350_v32 }
 0x496   :  { %1795 = vmatpush1.bf16.msra.mxu1 %v2353_v41 }
 0x497   :  { %1797 = vmatprep.subr.bf16.mxu1 %v2356_v42 }
 0x49a   :  { %1799 = vmatpush1.bf16.msra.mxu1 %v2359_v49 }
 0x49b   :  { %1801 = vmatprep.subr.bf16.mxu1 %v2362_v50 }
 0x49e   :  { %1803 = vmatpush1.bf16.msra.mxu1 %v2365_v60 }
 0x49f   :  { %1805 = vmatprep.subr.bf16.mxu1 %v2368_v61 }
 0x4a2   :  { %1807 = vmatpush1.bf16.msra.mxu1 %v2371_v3 }
 0x4a3   :  { %1809 = vmatprep.subr.bf16.mxu1 %v2374_v4 }
 0x4a6   :  { %1811 = vmatpush1.bf16.msra.mxu1 %v2377_v17 }
 0x4a7   :  { %1813 = vmatprep.subr.bf16.mxu1 %v2380_v19 }
 0x4aa   :  { %1815 = vmatpush1.bf16.msra.mxu1 %v2383_v28 }
 0x4ab   :  { %1817 = vmatprep.subr.bf16.mxu1 %v2386_v33 }
 0x4ae   :  { %1819 = vmatpush1.bf16.msra.mxu1 %v2389_v46 }
 0x4af   :  { %1821 = vmatprep.subr.bf16.mxu1 %v2392_v51 }
 0x4b2   :  { %1823 = vmatpush1.bf16.msra.mxu1 %v2395_v0 }
 0x4b3   :  { %1825 = vmatprep.subr.bf16.mxu1 %v2398_v6 }
 0x4b6   :  { %1827 = vmatpush1.bf16.msra.mxu1 %v2401_v29 }
 0x4b7   :  { %1829 = vmatprep.subr.bf16.mxu1 %v2404_v30 }
 0x4ba   :  { %1831 = vmatpush1.bf16.msra.mxu1 %v2407_v37 }
 0x4bb   :  { %1833 = vmatprep.subr.bf16.mxu1 %v2437_v59 }
 0x4be   :  { %1835 = vmatpush1.bf16.msra.mxu1 %v2439_v1 }
 0x4bf   :  { %1837 = vmatprep.subr.bf16.mxu1 %v2445_v8 }
 0x4c2   :  { %1839 = vmatpush1.bf16.msra.mxu1 %v2447_v22 }
 0x4c3   :  { %1841 = vmatprep.subr.bf16.mxu1 %v2453_v27 }
 0x4c6   :  { %1843 = vmatpush1.bf16.msra.mxu1 %v2455_v40 }
 0x4c7   :  { %1845 = vmatprep.subr.bf16.mxu1 %v2461_v57 }
 0x4ca   :  { %1847 = vmatpush1.bf16.msra.mxu1 %v2463_v9 }
 0x560   :  { %v890_v5 = vpop.f32.mrb[4].mxu1 }
 0x561   :  { %v891_v44 = vadd.f32 %v890_v5, %v174_v21  ;;  %v892_v47 = vpop.f32.mrb[5].mxu1 }
 0x562   :  { %v893_v48 = vadd.f32 %v892_v47, %v2294_v11 }
 0x564   :  { %1938 = vtanh.f32 %v893_v48 }
 0x565   :  { %1940 = vtanh.f32 %v891_v44 }
 0x56e   :  { %v1939_v53 = vpop.eup %1938 }
 0x56f   :  { %v1941_v54 = vpop.eup %1940  ;;  %897 = vst [vmem:[#allocation5 + $0x20] sm:$0xff] %v1939_v53  ;;  %1028 = vmatprep.mubr.f32.mxu0 %v1939_v53 }
 0x570   :  { %1029 = vmatmul.mubr.f32.vlgmr.msra.gmra.mrb[12].mxu0 %v1941_v54 }
 0x571   :  { %1851 = vmatpush1.bf16.msra.mxu0 %v2340_v18 }
 0x572   :  { %1853 = vmatprep.subr.bf16.mxu0 %v2342_v23 }
 0x575   :  { %1855 = vmatpush1.bf16.msra.mxu0 %v2347_v31 }
 0x576   :  { %1857 = vmatprep.subr.bf16.mxu0 %v2350_v32 }
 0x579   :  { %1859 = vmatpush1.bf16.msra.mxu0 %v2353_v41 }
 0x57a   :  { %1861 = vmatprep.subr.bf16.mxu0 %v2356_v42  ;;  %v1039_v42 = vld [vmem:[#allocation5 + $0x38] sm:$0xff] }
 0x57d   :  { %1863 = vmatpush1.bf16.msra.mxu0 %v2359_v49 }
 0x57e   :  { %1865 = vmatprep.subr.bf16.mxu0 %v2362_v50 }
 0x581   :  { %1867 = vmatpush1.bf16.msra.mxu0 %v2365_v60 }
 0x582   :  { %1869 = vmatprep.subr.bf16.mxu0 %v2368_v61 }
 0x585   :  { %1871 = vmatpush1.bf16.msra.mxu0 %v2371_v3 }
 0x586   :  { %1873 = vmatprep.subr.bf16.mxu0 %v2374_v4 }
 0x589   :  { %1875 = vmatpush1.bf16.msra.mxu0 %v2377_v17 }
 0x58a   :  { %1877 = vmatprep.subr.bf16.mxu0 %v2380_v19 }
 0x58d   :  { %1879 = vmatpush1.bf16.msra.mxu0 %v2383_v28 }
 0x58e   :  { %1881 = vmatprep.subr.bf16.mxu0 %v2386_v33 }
 0x591   :  { %1883 = vmatpush1.bf16.msra.mxu0 %v2389_v46 }
 0x592   :  { %1885 = vmatprep.subr.bf16.mxu0 %v2392_v51 }
 0x595   :  { %1887 = vmatpush1.bf16.msra.mxu0 %v2395_v0 }
 0x596   :  { %1889 = vmatprep.subr.bf16.mxu0 %v2398_v6 }
 0x599   :  { %1891 = vmatpush1.bf16.msra.mxu0 %v2401_v29 }
 0x59a   :  { %1893 = vmatprep.subr.bf16.mxu0 %v2404_v30 }
 0x59d   :  { %1895 = vmatpush1.bf16.msra.mxu0 %v2407_v37 }
 0x59e   :  { %1897 = vmatprep.subr.bf16.mxu0 %v2437_v59 }
 0x5a1   :  { %1899 = vmatpush1.bf16.msra.mxu0 %v2439_v1 }
 0x5a2   :  { %1901 = vmatprep.subr.bf16.mxu0 %v2445_v8 }
 0x5a5   :  { %1903 = vmatpush1.bf16.msra.mxu0 %v2447_v22 }
 0x5a6   :  { %1905 = vmatprep.subr.bf16.mxu0 %v2453_v27 }
 0x5a9   :  { %1907 = vmatpush1.bf16.msra.mxu0 %v2455_v40 }
 0x5aa   :  { %1909 = vmatprep.subr.bf16.mxu0 %v2461_v57 }
 0x5ad   :  { %1911 = vmatpush1.bf16.msra.mxu0 %v2463_v9 }
 0x643   :  { %v1030_v20 = vpop.f32.mrb[12].mxu0 }
 0x644   :  { %v1031_v18 = vadd.f32 %v1030_v20, %v899_v56  ;;  %v1032_v23 = vpop.f32.mrb[13].mxu0 }
 0x645   :  { %v1033_v31 = vadd.f32 %v1032_v23, %v2294_v11 }
 0x647   :  { %1942 = vtanh.f32 %v1033_v31 }
 0x648   :  { %1944 = vtanh.f32 %v1031_v18 }
 0x651   :  { %v1943_v32 = vpop.eup %1942 }
 0x652   :  { %v1945_v41 = vpop.eup %1944  ;;  %1037 = vst [vmem:[#allocation5 + $0x28] sm:$0xff] %v1943_v32  ;;  %1168 = vmatprep.mubr.f32.mxu1 %v1943_v32 }
 0x653   :  { %1169 = vmatmul.mubr.f32.vlgmr.msra.gmra.mrb[6].mxu1 %v1945_v41 }
 0x726   :  { %v1170_v49 = vpop.f32.mrb[6].mxu1 }
 0x727   :  { %v1171_v50 = vadd.f32 %v1170_v49, %v1039_v42  ;;  %v1172_v60 = vpop.f32.mrb[7].mxu1 }
 0x728   :  { %v1173_v61 = vadd.f32 %v1172_v60, %v2294_v11 }
 0x729   :  { %1946 = vtanh.f32 %v1171_v50 }
 0x72a   :  { %1948 = vtanh.f32 %v1173_v61 }
 0x733   :  { %v1947_v3 = vpop.eup %1946 }
 0x734   :  { %v1949_v4 = vpop.eup %1948  ;;  %1315 = vst [vmem:[#allocation6] sm:$0xff] %v1947_v3 }
 0x735   :  { %1177 = vst [vmem:[#allocation5 + $0x30] sm:$0xff] %v1949_v4  ;;  %1306 = vmatprep.mubr.f32.mxu0 %v1949_v4 }
 0x736   :  { %1307 = vmatmul.mubr.f32.vlgmr.msra.gmra.mrb[14].mxu0 %v1947_v3 }
 0x809   :  { %v1308_v17 = vpop.f32.mrb[14].mxu0 }
 0x80a   :  { %v1309_v19 = vpop.f32.mrb[15].mxu0 }
 0x80b   :  { %v1312_v28 = vadd.f32 %v1309_v19, %v2294_v11 }
 0x80d   :  { %1950 = vtanh.f32 %v1312_v28 }
 0x817   :  { %v1951_v33 = vpop.eup %1950 }
 0x818   :  { %1314 = vst [vmem:[#allocation5 + $0x38] sm:$0xff] %v1951_v33  ;;  %1317 = vst [vmem:[#allocation6 + $0x8] sm:$0xff] %v1951_v33 }
 0x819   :  { %1985 = shalt.err (!%p1982_p12)
}
 0x81a   :  { %s1986_s17 = scalar_lea.hbm %s2578_s5, 1024 }
 0x81b   :  { %p1987_p13 = scmp.ne.s32.totalorder %s2578_s5, %s1986_s17  ;;  %p1990_p0 = scmp.lt.u32.totalorder %s1986_s17, %s2578_s5 }
 0x81d   :  { %p1992_p1 = pnand %p1990_p0, %p1987_p13 }
 0x81f   :  { %1995 = shalt.err (!%p1992_p1)
}
 0x820   :  { %s2030_s20 = smov 128   ;;  %s2031_s21 = smov 8  }
 0x821   :  { %1329 = dma.vmem_to_hbm [thread:$0]  %s1324_s4, 1024, %s2578_s5, [#allocation4], %s2030_s20, %s2030_s20, %s2031_s21  }
 0x822   :  { %s1996_s23 = scalar_lea.vmem %s2542_s13, 256  ;;  %p2001_p3 = scmp.lt.s32.totalorder %s2542_s13, %s2542_s13 }
 0x823   :  { %p1997_p2 = scmp.ne.s32.totalorder %s2542_s13, %s1996_s23  ;;  %p2002_p4 = scmp.lt.s32.totalorder %s1996_s23, %s1996_s23 }
 0x825   :  { %p2003_p5 = por %p2002_p4, %p2001_p3 }
 0x827   :  { %p2004_p6 = pnand %p2003_p5, %p1997_p2 }
 0x829   :  { %2007 = shalt.err (!%p2004_p6)
}
 0x82a   :  { %s2008_s26 = scalar_lea.hbm %s2579_s6, 256 }
 0x82b   :  { %p2009_p7 = scmp.ne.s32.totalorder %s2579_s6, %s2008_s26  ;;  %p2012_p8 = scmp.lt.u32.totalorder %s2008_s26, %s2579_s6 }
 0x82d   :  { %p2014_p9 = pnand %p2012_p8, %p2009_p7 }
 0x82f   :  { %2017 = shalt.err (!%p2014_p9)
}
 0x830   :  { %1341 = dma.vmem_to_hbm [thread:$0]  %s2542_s13, 256, %s2579_s6, [#allocation7], %s2030_s20, %s2030_s20, %s2031_s21  }
 0x831   :  { %2020 = dma.done.wait [#allocation4], 1024  }
 0x832   :  { %2021 = vsyncadd [#allocation4], 4294966272 }
 0x833   :  { %2022 = dma.done.wait [#allocation7], 256  }
 0x834   :  { %2023 = vsyncadd [#allocation7], 4294967040 }
 0x835   :  { %1348 = vsyncpa [#allocation3], 1 }
 0x836   :  { %1349 = vsyncpa [#allocation4], 1 }
 0x837   :  { %1350 = vsyncpa [#allocation7], 1 }

</bundles_post_ra>
